<compile_context>
chip_gen: v6e
topology: v6e:2x2x1
jax: 0.10.0
libtpu: 0.0.40
codegen_flags: <defaults>
</compile_context>

<pallas_src>
from functools import partial

import jax
import jax.numpy as jnp
from jax.experimental import pallas as pl
from jax.experimental.pallas import tpu as pltpu


def _conv_kernel(x_ref, gx_ref, gy_ref, o_ref, xpad_ref, tmp_ref, *,
                 tb, h, w, fh, fw, fnum, hout, hp, ws, wc, wtot, ph, pw):
    """Separable direct 2-D conv over a lane-packed batch slab.

    x_ref    : (tb, H, W)             raw input block (no HBM pre-padding)
    gx_ref   : (fnum*fh,)  SMEM       height-axis factors (/(max+eps) folded in)
    gy_ref   : (fnum*fw,)  SMEM       width-axis factors
    o_ref    : (1, fnum, hout, wc)    packed output (wc = tb*ws; the last fw-1
                                      columns of every ws-wide segment are junk
                                      and get sliced off in the wrapper)
    xpad_ref : (hp, wtot)  VMEM       zero-padded, lane-packed input slab
    tmp_ref  : (fnum, hp, wc) VMEM    horizontally filtered intermediates
    """
    # Re-zero the slab every step: scratch is per-core under megacore sharding of
    # the 'parallel' axis, so an init-once at program_id==0 would leave the other
    # core's halo undefined.  Interior is fully overwritten below.
    xpad_ref[...] = jnp.zeros((hp, wtot), jnp.float32)

    # Pack this step's batch images side by side along lanes, each with its halo.
    # TODO(synk): move this unaligned repack onto the DMA engine
    # (memory_space=pl.ANY input + make_async_copy into column b*ws+pw with a
    # double-buffered xpad) to free vst/XLU slots; biggest relative win on v5e.
    for b in range(tb):
        c0 = b * ws + pw
        xpad_ref[ph:ph + h, c0:c0 + w] = x_ref[b]

    # ---- Pass 1: horizontal (width / lane axis), fw taps per filter ----------
    # One lane-shifted window per tap, shared across all fnum filters; the
    # per-filter accumulators stay in vregs (budgeted by _pick_batch_tile).
    tmps = [jnp.zeros((hp, wc), jnp.float32) for _ in range(fnum)]
    for v in range(fw):
        win = xpad_ref[:, v:v + wc]                     # lane-offset ref load
        for f in range(fnum):
            tmps[f] = tmps[f] + gy_ref[f * fw + v] * win
    for f in range(fnum):
        tmp_ref[f] = tmps[f]

    # ---- Pass 2: vertical (height / sublane axis), fh taps per filter --------
    for f in range(fnum):
        acc = jnp.zeros((hout, wc), jnp.float32)
        for u in range(fh):
            acc = acc + gx_ref[f * fh + u] * tmp_ref[f, u:u + hout, :]
        o_ref[0, f] = acc
    # TODO(synk): when wout >= 128, write unpacked (tb, fnum, hout, wout) blocks
    # directly here to drop the wrapper-side repack HBM pass.


def _make_separable_gaussian_factors(mean_x, mean_y, sigma_x, sigma_y, filter_size):
    """1-D factors gx (height, fh taps) and gy (width, fw taps) such that
    filters_2d[f, u, v] == gx[f, u] * gy[f, v], with the per-filter
    /(max(g2d) + eps) normalisation folded exactly into gx."""
    fh, fw = filter_size
    eps = 1e-3
    xs = jnp.linspace(-1.0, 1.0, fh, dtype=jnp.float32)   # height axis (X)
    ys = jnp.linspace(-1.0, 1.0, fw, dtype=jnp.float32)   # width axis  (Y)
    sx = jnp.maximum(sigma_x.astype(jnp.float32), eps)[:, None]
    sy = jnp.maximum(sigma_y.astype(jnp.float32), eps)[:, None]
    mx = mean_x.astype(jnp.float32)[:, None]
    my = mean_y.astype(jnp.float32)[:, None]
    gx = jnp.exp(-((xs[None, :] - mx) ** 2) / (2.0 * sx ** 2))   # (fnum, fh)
    gy = jnp.exp(-((ys[None, :] - my) ** 2) / (2.0 * sy ** 2))   # (fnum, fw)
    # max over the 2-D grid of gx[u]*gy[v] (both positive) = max(gx) * max(gy).
    denom = (jnp.max(gx, axis=1, keepdims=True) *
             jnp.max(gy, axis=1, keepdims=True) + eps)
    gx = gx / denom
    return gx, gy


_VMEM_TILE_BUDGET = 40 << 20      # keep tiles comfortably inside v7x's 64 MiB VMEM
_F32 = 4


def _round_up(x, m):
    return (x + m - 1) // m * m


def _vmem_bytes(tb, fnum, H, W, hp, hout, ws, fw):
    """Rough VMEM footprint: 2x input block, 2x output block, both scratch slabs."""
    wc = tb * ws
    wtot = wc + fw - 1
    in_block = tb * _round_up(H, 8) * _round_up(W, 128) * _F32
    out_block = fnum * _round_up(hout, 8) * _round_up(wc, 128) * _F32
    xpad = _round_up(hp, 8) * _round_up(wtot, 128) * _F32
    tmp = fnum * _round_up(hp, 8) * _round_up(wc, 128) * _F32
    return 2 * in_block + 2 * out_block + xpad + tmp


def _pick_batch_tile(B, fnum, H, W, hp, hout, ws, fw):
    """Largest divisor of B whose pass-1 f32 accumulators stay in vregs and whose
    buffers fit the VMEM budget, preferring >= 2 grid steps (megacore sharding)."""
    best = 1
    for tb in range(1, B + 1):
        if B % tb:
            continue
        if B >= 2 and B // tb < 2:
            continue            # keep >= 2 'parallel' steps so v7x feeds both TCs
        wc = tb * ws
        acc_vregs = (fnum + 1) * pl.cdiv(hp, 8) * pl.cdiv(wc, 128)
        if acc_vregs > 32:
            continue
        if _vmem_bytes(tb, fnum, H, W, hp, hout, ws, fw) > _VMEM_TILE_BUDGET:
            continue
        best = tb
    return best


def gaussnet_layer_2d(input_tensor, mean_x, mean_y, sigma_x, sigma_y, filter_size):
    fh, fw = filter_size
    fnum = int(mean_x.shape[0])
    gx, gy = _make_separable_gaussian_factors(mean_x, mean_y, sigma_x, sigma_y,
                                              filter_size)
    gx_flat = gx.reshape(-1)                       # (fnum*fh,) -> SMEM
    gy_flat = gy.reshape(-1)                       # (fnum*fw,) -> SMEM

    assert input_tensor.ndim == 4, "input_tensor should be (B, C, H, W)"
    B, C, H, W = input_tensor.shape
    assert C == 1, "conv2d weight has in_channels=1 (groups=1), so C must be 1"

    ph, pw = fh // 2, fw // 2
    hout = H + 2 * ph - fh + 1
    wout = W + 2 * pw - fw + 1
    hp = H + 2 * ph                   # padded height (= hout + fh - 1)
    ws = W + 2 * pw                   # per-segment padded width (= wout + fw - 1)

    tb = _pick_batch_tile(B, fnum, H, W, hp, hout, ws, fw)
    g = B // tb
    wc = tb * ws                      # packed lane width per grid step
    wtot = wc + fw - 1                # scratch slab width (room for max lane shift)

    x2 = input_tensor[:, 0].astype(jnp.float32)    # (B, H, W), no HBM pre-pad pass

    kern = partial(_conv_kernel, tb=tb, h=H, w=W, fh=fh, fw=fw, fnum=fnum,
                   hout=hout, hp=hp, ws=ws, wc=wc, wtot=wtot, ph=ph, pw=pw)

    cost = pl.CostEstimate(
        flops=int(2 * B * fnum * (fh + fw) * hout * wout),
        transcendentals=0,
        bytes_accessed=int(4 * (B * H * W + B * fnum * hout * wout
                                + gx_flat.size + gy_flat.size)),
    )

    est = _vmem_bytes(tb, fnum, H, W, hp, hout, ws, fw)
    vmem_limit = int(min(48 << 20, max(32 << 20, est + (8 << 20))))

    # TODO(synk): for large H also tile rows (second 'parallel' grid axis with
    # halo'd row windows) to bound VMEM on v7x and create more grid steps.
    out_packed = pl.pallas_call(
        kern,
        out_shape=jax.ShapeDtypeStruct((g, fnum, hout, wc), jnp.float32),
        grid=(g,),
        in_specs=[
            pl.BlockSpec((tb, H, W), lambda i: (i, 0, 0)),
            pl.BlockSpec(memory_space=pltpu.MemorySpace.SMEM),
            pl.BlockSpec(memory_space=pltpu.MemorySpace.SMEM),
        ],
        out_specs=pl.BlockSpec((1, fnum, hout, wc), lambda i: (i, 0, 0, 0)),
        scratch_shapes=[
            pltpu.VMEM((hp, wtot), jnp.float32),        # padded, lane-packed slab
            pltpu.VMEM((fnum, hp, wc), jnp.float32),    # horizontal-pass output
        ],
        compiler_params=pltpu.CompilerParams(
            dimension_semantics=("parallel",),
            vmem_limit_bytes=vmem_limit,
        ),
        cost_estimate=cost,
    )(x2, gx_flat, gy_flat)

    # Unpack lane-packed output: drop the fw-1 junk columns per segment and
    # restore NCHW.  Pure layout plumbing (cheap XLA reshape/transpose/slice).
    out = out_packed.reshape(g, fnum, hout, tb, ws)[..., :wout]
    out = out.transpose(0, 3, 1, 2, 4).reshape(B, fnum, hout, wout)
    return out


if __name__ == "__main__":
    filter_num = 4
    filter_size = (5, 5)

    # Deterministic parameter init, matching the module's __init__.
    mean_x = jnp.full((filter_num,), 0.01, dtype=jnp.float32)
    mean_y = jnp.full((filter_num,), 0.01, dtype=jnp.float32)
    sigma_x = jnp.full((filter_num,), 1.0, dtype=jnp.float32)
    sigma_y = jnp.full((filter_num,), 1.0, dtype=jnp.float32)

    key = jax.random.PRNGKey(0)
    x = jax.random.normal(key, (2, 1, 16, 16), dtype=jnp.float32)

    fwd = jax.jit(gaussnet_layer_2d, static_argnames=("filter_size",))
    out = fwd(x, mean_x, mean_y, sigma_x, sigma_y, filter_size=filter_size)
    out = jax.block_until_ready(out)
    assert out.shape == (2, filter_num, 16, 16), out.shape

    # Reference check against XLA's conv (same semantics as F.conv2d).
    gx_r, gy_r = _make_separable_gaussian_factors(mean_x, mean_y, sigma_x, sigma_y,
                                                  filter_size)
    filters = gx_r[:, :, None] * gy_r[:, None, :]          # (fnum, fh, fw)
    ref = jax.lax.conv_general_dilated(
        x, filters[:, None, :, :],
        window_strides=(1, 1),
        padding=((filter_size[0] // 2,) * 2, (filter_size[1] // 2,) * 2),
        dimension_numbers=("NCHW", "OIHW", "NCHW"),
        precision=jax.lax.Precision.HIGHEST,
    )
    max_err = float(jnp.max(jnp.abs(out - ref)))
    assert jnp.allclose(out, ref, atol=1e-4, rtol=1e-3), max_err

    print("KERNEL_OK")
</pallas_src>

<mosaic_0001>
module attributes {stable_mosaic.version = 11 : i64} {
  func.func @_conv_kernel(%arg0: i32, %arg1: memref<1x16x16xf32, #tpu.memory_space<vmem>>, %arg2: memref<20xf32, #tpu.memory_space<smem>>, %arg3: memref<20xf32, #tpu.memory_space<smem>>, %arg4: memref<1x4x16x20xf32, #tpu.memory_space<vmem>>, %arg5: memref<20x24xf32, #tpu.memory_space<vmem>>, %arg6: memref<4x20x20xf32, #tpu.memory_space<vmem>>) attributes {dimension_semantics = [#tpu.dimension_semantics<parallel>], iteration_bounds = array<i64: 2>, scalar_prefetch = 0 : i64, scratch_operands = 2 : i64, tpu.core_type = #tpu.core_type<tc>, window_params = [{transform_indices = @transform_0, window_bounds = array<i64: 1, 16, 16>}, {transform_indices = @transform_1, window_bounds = array<i64: 20>}, {transform_indices = @transform_2, window_bounds = array<i64: 20>}, {transform_indices = @transform_3, window_bounds = array<i64: 1, 4, 16, 20>}]} {
    %cst = arith.constant 0.000000e+00 : f32
    %0 = vector.broadcast %cst : f32 to vector<20x24xf32>
    %c0 = arith.constant 0 : index
    %c0_0 = arith.constant 0 : index
    %1 = vector.load %arg5[%c0, %c0_0] : memref<20x24xf32, #tpu.memory_space<vmem>>, vector<20x24xf32>
    tpu.vector_store %arg5[%c0, %c0_0], %0 {strides = array<i32>} : memref<20x24xf32, #tpu.memory_space<vmem>>, vector<20x24xf32>,
    %c0_1 = arith.constant 0 : index
    %c0_2 = arith.constant 0 : index
    %c0_3 = arith.constant 0 : index
    %2 = vector.load %arg1[%c0_1, %c0_2, %c0_3] : memref<1x16x16xf32, #tpu.memory_space<vmem>>, vector<1x16x16xf32>
    %3 = vector.shape_cast %2 : vector<1x16x16xf32> to vector<16x16xf32>
    %c2 = arith.constant 2 : index
    %c2_4 = arith.constant 2 : index
    %4 = vector.load %arg5[%c2, %c2_4] : memref<20x24xf32, #tpu.memory_space<vmem>>, vector<16x16xf32>
    tpu.vector_store %arg5[%c2, %c2_4], %3 {strides = array<i32>} : memref<20x24xf32, #tpu.memory_space<vmem>>, vector<16x16xf32>,
    %cst_5 = arith.constant 0.000000e+00 : f32
    %5 = vector.broadcast %cst_5 : f32 to vector<20x20xf32>
    %cst_6 = arith.constant 0.000000e+00 : f32
    %6 = vector.broadcast %cst_6 : f32 to vector<20x20xf32>
    %cst_7 = arith.constant 0.000000e+00 : f32
    %7 = vector.broadcast %cst_7 : f32 to vector<20x20xf32>
    %cst_8 = arith.constant 0.000000e+00 : f32
    %8 = vector.broadcast %cst_8 : f32 to vector<20x20xf32>
    %c0_9 = arith.constant 0 : index
    %c0_10 = arith.constant 0 : index
    %9 = vector.load %arg5[%c0_9, %c0_10] : memref<20x24xf32, #tpu.memory_space<vmem>>, vector<20x20xf32>
    %c0_11 = arith.constant 0 : index
    %10 = memref.load %arg3[%c0_11] : memref<20xf32, #tpu.memory_space<smem>>
    %11 = vector.broadcast %10 : f32 to vector<20x20xf32>
    %12 = arith.mulf %11, %9 : vector<20x20xf32>
    %13 = arith.addf %5, %12 : vector<20x20xf32>
    %c5 = arith.constant 5 : index
    %14 = memref.load %arg3[%c5] : memref<20xf32, #tpu.memory_space<smem>>
    %15 = vector.broadcast %14 : f32 to vector<20x20xf32>
    %16 = arith.mulf %15, %9 : vector<20x20xf32>
    %17 = arith.addf %6, %16 : vector<20x20xf32>
    %c10 = arith.constant 10 : index
    %18 = memref.load %arg3[%c10] : memref<20xf32, #tpu.memory_space<smem>>
    %19 = vector.broadcast %18 : f32 to vector<20x20xf32>
    %20 = arith.mulf %19, %9 : vector<20x20xf32>
    %21 = arith.addf %7, %20 : vector<20x20xf32>
    %c15 = arith.constant 15 : index
    %22 = memref.load %arg3[%c15] : memref<20xf32, #tpu.memory_space<smem>>
    %23 = vector.broadcast %22 : f32 to vector<20x20xf32>
    %24 = arith.mulf %23, %9 : vector<20x20xf32>
    %25 = arith.addf %8, %24 : vector<20x20xf32>
    %c0_12 = arith.constant 0 : index
    %c1 = arith.constant 1 : index
    %26 = vector.load %arg5[%c0_12, %c1] : memref<20x24xf32, #tpu.memory_space<vmem>>, vector<20x20xf32>
    %c1_13 = arith.constant 1 : index
    %27 = memref.load %arg3[%c1_13] : memref<20xf32, #tpu.memory_space<smem>>
    %28 = vector.broadcast %27 : f32 to vector<20x20xf32>
    %29 = arith.mulf %28, %26 : vector<20x20xf32>
    %30 = arith.addf %13, %29 : vector<20x20xf32>
    %c6 = arith.constant 6 : index
    %31 = memref.load %arg3[%c6] : memref<20xf32, #tpu.memory_space<smem>>
    %32 = vector.broadcast %31 : f32 to vector<20x20xf32>
    %33 = arith.mulf %32, %26 : vector<20x20xf32>
    %34 = arith.addf %17, %33 : vector<20x20xf32>
    %c11 = arith.constant 11 : index
    %35 = memref.load %arg3[%c11] : memref<20xf32, #tpu.memory_space<smem>>
    %36 = vector.broadcast %35 : f32 to vector<20x20xf32>
    %37 = arith.mulf %36, %26 : vector<20x20xf32>
    %38 = arith.addf %21, %37 : vector<20x20xf32>
    %c16 = arith.constant 16 : index
    %39 = memref.load %arg3[%c16] : memref<20xf32, #tpu.memory_space<smem>>
    %40 = vector.broadcast %39 : f32 to vector<20x20xf32>
    %41 = arith.mulf %40, %26 : vector<20x20xf32>
    %42 = arith.addf %25, %41 : vector<20x20xf32>
    %c0_14 = arith.constant 0 : index
    %c2_15 = arith.constant 2 : index
    %43 = vector.load %arg5[%c0_14, %c2_15] : memref<20x24xf32, #tpu.memory_space<vmem>>, vector<20x20xf32>
    %c2_16 = arith.constant 2 : index
    %44 = memref.load %arg3[%c2_16] : memref<20xf32, #tpu.memory_space<smem>>
    %45 = vector.broadcast %44 : f32 to vector<20x20xf32>
    %46 = arith.mulf %45, %43 : vector<20x20xf32>
    %47 = arith.addf %30, %46 : vector<20x20xf32>
    %c7 = arith.constant 7 : index
    %48 = memref.load %arg3[%c7] : memref<20xf32, #tpu.memory_space<smem>>
    %49 = vector.broadcast %48 : f32 to vector<20x20xf32>
    %50 = arith.mulf %49, %43 : vector<20x20xf32>
    %51 = arith.addf %34, %50 : vector<20x20xf32>
    %c12 = arith.constant 12 : index
    %52 = memref.load %arg3[%c12] : memref<20xf32, #tpu.memory_space<smem>>
    %53 = vector.broadcast %52 : f32 to vector<20x20xf32>
    %54 = arith.mulf %53, %43 : vector<20x20xf32>
    %55 = arith.addf %38, %54 : vector<20x20xf32>
    %c17 = arith.constant 17 : index
    %56 = memref.load %arg3[%c17] : memref<20xf32, #tpu.memory_space<smem>>
    %57 = vector.broadcast %56 : f32 to vector<20x20xf32>
    %58 = arith.mulf %57, %43 : vector<20x20xf32>
    %59 = arith.addf %42, %58 : vector<20x20xf32>
    %c0_17 = arith.constant 0 : index
    %c3 = arith.constant 3 : index
    %60 = vector.load %arg5[%c0_17, %c3] : memref<20x24xf32, #tpu.memory_space<vmem>>, vector<20x20xf32>
    %c3_18 = arith.constant 3 : index
    %61 = memref.load %arg3[%c3_18] : memref<20xf32, #tpu.memory_space<smem>>
    %62 = vector.broadcast %61 : f32 to vector<20x20xf32>
    %63 = arith.mulf %62, %60 : vector<20x20xf32>
    %64 = arith.addf %47, %63 : vector<20x20xf32>
    %c8 = arith.constant 8 : index
    %65 = memref.load %arg3[%c8] : memref<20xf32, #tpu.memory_space<smem>>
    %66 = vector.broadcast %65 : f32 to vector<20x20xf32>
    %67 = arith.mulf %66, %60 : vector<20x20xf32>
    %68 = arith.addf %51, %67 : vector<20x20xf32>
    %c13 = arith.constant 13 : index
    %69 = memref.load %arg3[%c13] : memref<20xf32, #tpu.memory_space<smem>>
    %70 = vector.broadcast %69 : f32 to vector<20x20xf32>
    %71 = arith.mulf %70, %60 : vector<20x20xf32>
    %72 = arith.addf %55, %71 : vector<20x20xf32>
    %c18 = arith.constant 18 : index
    %73 = memref.load %arg3[%c18] : memref<20xf32, #tpu.memory_space<smem>>
    %74 = vector.broadcast %73 : f32 to vector<20x20xf32>
    %75 = arith.mulf %74, %60 : vector<20x20xf32>
    %76 = arith.addf %59, %75 : vector<20x20xf32>
    %c0_19 = arith.constant 0 : index
    %c4 = arith.constant 4 : index
    %77 = vector.load %arg5[%c0_19, %c4] : memref<20x24xf32, #tpu.memory_space<vmem>>, vector<20x20xf32>
    %c4_20 = arith.constant 4 : index
    %78 = memref.load %arg3[%c4_20] : memref<20xf32, #tpu.memory_space<smem>>
    %79 = vector.broadcast %78 : f32 to vector<20x20xf32>
    %80 = arith.mulf %79, %77 : vector<20x20xf32>
    %81 = arith.addf %64, %80 : vector<20x20xf32>
    %c9 = arith.constant 9 : index
    %82 = memref.load %arg3[%c9] : memref<20xf32, #tpu.memory_space<smem>>
    %83 = vector.broadcast %82 : f32 to vector<20x20xf32>
    %84 = arith.mulf %83, %77 : vector<20x20xf32>
    %85 = arith.addf %68, %84 : vector<20x20xf32>
    %c14 = arith.constant 14 : index
    %86 = memref.load %arg3[%c14] : memref<20xf32, #tpu.memory_space<smem>>
    %87 = vector.broadcast %86 : f32 to vector<20x20xf32>
    %88 = arith.mulf %87, %77 : vector<20x20xf32>
    %89 = arith.addf %72, %88 : vector<20x20xf32>
    %c19 = arith.constant 19 : index
    %90 = memref.load %arg3[%c19] : memref<20xf32, #tpu.memory_space<smem>>
    %91 = vector.broadcast %90 : f32 to vector<20x20xf32>
    %92 = arith.mulf %91, %77 : vector<20x20xf32>
    %93 = arith.addf %76, %92 : vector<20x20xf32>
    %c0_21 = arith.constant 0 : index
    %c0_22 = arith.constant 0 : index
    %c0_23 = arith.constant 0 : index
    %94 = vector.load %arg6[%c0_21, %c0_22, %c0_23] : memref<4x20x20xf32, #tpu.memory_space<vmem>>, vector<1x20x20xf32>
    %95 = vector.shape_cast %94 : vector<1x20x20xf32> to vector<20x20xf32>
    %96 = vector.shape_cast %81 : vector<20x20xf32> to vector<1x20x20xf32>
    tpu.vector_store %arg6[%c0_21, %c0_22, %c0_23], %96 {strides = array<i32>} : memref<4x20x20xf32, #tpu.memory_space<vmem>>, vector<1x20x20xf32>,
    %c1_24 = arith.constant 1 : index
    %c0_25 = arith.constant 0 : index
    %c0_26 = arith.constant 0 : index
    %97 = vector.load %arg6[%c1_24, %c0_25, %c0_26] : memref<4x20x20xf32, #tpu.memory_space<vmem>>, vector<1x20x20xf32>
    %98 = vector.shape_cast %97 : vector<1x20x20xf32> to vector<20x20xf32>
    %99 = vector.shape_cast %85 : vector<20x20xf32> to vector<1x20x20xf32>
    tpu.vector_store %arg6[%c1_24, %c0_25, %c0_26], %99 {strides = array<i32>} : memref<4x20x20xf32, #tpu.memory_space<vmem>>, vector<1x20x20xf32>,
    %c2_27 = arith.constant 2 : index
    %c0_28 = arith.constant 0 : index
    %c0_29 = arith.constant 0 : index
    %100 = vector.load %arg6[%c2_27, %c0_28, %c0_29] : memref<4x20x20xf32, #tpu.memory_space<vmem>>, vector<1x20x20xf32>
    %101 = vector.shape_cast %100 : vector<1x20x20xf32> to vector<20x20xf32>
    %102 = vector.shape_cast %89 : vector<20x20xf32> to vector<1x20x20xf32>
    tpu.vector_store %arg6[%c2_27, %c0_28, %c0_29], %102 {strides = array<i32>} : memref<4x20x20xf32, #tpu.memory_space<vmem>>, vector<1x20x20xf32>,
    %c3_30 = arith.constant 3 : index
    %c0_31 = arith.constant 0 : index
    %c0_32 = arith.constant 0 : index
    %103 = vector.load %arg6[%c3_30, %c0_31, %c0_32] : memref<4x20x20xf32, #tpu.memory_space<vmem>>, vector<1x20x20xf32>
    %104 = vector.shape_cast %103 : vector<1x20x20xf32> to vector<20x20xf32>
    %105 = vector.shape_cast %93 : vector<20x20xf32> to vector<1x20x20xf32>
    tpu.vector_store %arg6[%c3_30, %c0_31, %c0_32], %105 {strides = array<i32>} : memref<4x20x20xf32, #tpu.memory_space<vmem>>, vector<1x20x20xf32>,
    %cst_33 = arith.constant 0.000000e+00 : f32
    %106 = vector.broadcast %cst_33 : f32 to vector<16x20xf32>
    %c0_34 = arith.constant 0 : index
    %107 = memref.load %arg2[%c0_34] : memref<20xf32, #tpu.memory_space<smem>>
    %c0_35 = arith.constant 0 : index
    %c0_36 = arith.constant 0 : index
    %c0_37 = arith.constant 0 : index
    %108 = vector.load %arg6[%c0_35, %c0_36, %c0_37] : memref<4x20x20xf32, #tpu.memory_space<vmem>>, vector<1x16x20xf32>
    %109 = vector.shape_cast %108 : vector<1x16x20xf32> to vector<16x20xf32>
    %110 = vector.broadcast %107 : f32 to vector<16x20xf32>
    %111 = arith.mulf %110, %109 : vector<16x20xf32>
    %112 = arith.addf %106, %111 : vector<16x20xf32>
    %c1_38 = arith.constant 1 : index
    %113 = memref.load %arg2[%c1_38] : memref<20xf32, #tpu.memory_space<smem>>
    %c0_39 = arith.constant 0 : index
    %c1_40 = arith.constant 1 : index
    %c0_41 = arith.constant 0 : index
    %114 = vector.load %arg6[%c0_39, %c1_40, %c0_41] : memref<4x20x20xf32, #tpu.memory_space<vmem>>, vector<1x16x20xf32>
    %115 = vector.shape_cast %114 : vector<1x16x20xf32> to vector<16x20xf32>
    %116 = vector.broadcast %113 : f32 to vector<16x20xf32>
    %117 = arith.mulf %116, %115 : vector<16x20xf32>
    %118 = arith.addf %112, %117 : vector<16x20xf32>
    %c2_42 = arith.constant 2 : index
    %119 = memref.load %arg2[%c2_42] : memref<20xf32, #tpu.memory_space<smem>>
    %c0_43 = arith.constant 0 : index
    %c2_44 = arith.constant 2 : index
    %c0_45 = arith.constant 0 : index
    %120 = vector.load %arg6[%c0_43, %c2_44, %c0_45] : memref<4x20x20xf32, #tpu.memory_space<vmem>>, vector<1x16x20xf32>
    %121 = vector.shape_cast %120 : vector<1x16x20xf32> to vector<16x20xf32>
    %122 = vector.broadcast %119 : f32 to vector<16x20xf32>
    %123 = arith.mulf %122, %121 : vector<16x20xf32>
    %124 = arith.addf %118, %123 : vector<16x20xf32>
    %c3_46 = arith.constant 3 : index
    %125 = memref.load %arg2[%c3_46] : memref<20xf32, #tpu.memory_space<smem>>
    %c0_47 = arith.constant 0 : index
    %c3_48 = arith.constant 3 : index
    %c0_49 = arith.constant 0 : index
    %126 = vector.load %arg6[%c0_47, %c3_48, %c0_49] : memref<4x20x20xf32, #tpu.memory_space<vmem>>, vector<1x16x20xf32>
    %127 = vector.shape_cast %126 : vector<1x16x20xf32> to vector<16x20xf32>
    %128 = vector.broadcast %125 : f32 to vector<16x20xf32>
    %129 = arith.mulf %128, %127 : vector<16x20xf32>
    %130 = arith.addf %124, %129 : vector<16x20xf32>
    %c4_50 = arith.constant 4 : index
    %131 = memref.load %arg2[%c4_50] : memref<20xf32, #tpu.memory_space<smem>>
    %c0_51 = arith.constant 0 : index
    %c4_52 = arith.constant 4 : index
    %c0_53 = arith.constant 0 : index
    %132 = vector.load %arg6[%c0_51, %c4_52, %c0_53] : memref<4x20x20xf32, #tpu.memory_space<vmem>>, vector<1x16x20xf32>
    %133 = vector.shape_cast %132 : vector<1x16x20xf32> to vector<16x20xf32>
    %134 = vector.broadcast %131 : f32 to vector<16x20xf32>
    %135 = arith.mulf %134, %133 : vector<16x20xf32>
    %136 = arith.addf %130, %135 : vector<16x20xf32>
    %c0_54 = arith.constant 0 : index
    %c0_55 = arith.constant 0 : index
    %c0_56 = arith.constant 0 : index
    %c0_57 = arith.constant 0 : index
    %137 = vector.load %arg4[%c0_54, %c0_55, %c0_56, %c0_57] : memref<1x4x16x20xf32, #tpu.memory_space<vmem>>, vector<1x1x16x20xf32>
    %138 = vector.shape_cast %137 : vector<1x1x16x20xf32> to vector<16x20xf32>
    %139 = vector.shape_cast %136 : vector<16x20xf32> to vector<1x1x16x20xf32>
    tpu.vector_store %arg4[%c0_54, %c0_55, %c0_56, %c0_57], %139 {strides = array<i32>} : memref<1x4x16x20xf32, #tpu.memory_space<vmem>>, vector<1x1x16x20xf32>,
    %cst_58 = arith.constant 0.000000e+00 : f32
    %140 = vector.broadcast %cst_58 : f32 to vector<16x20xf32>
    %c5_59 = arith.constant 5 : index
    %141 = memref.load %arg2[%c5_59] : memref<20xf32, #tpu.memory_space<smem>>
    %c1_60 = arith.constant 1 : index
    %c0_61 = arith.constant 0 : index
    %c0_62 = arith.constant 0 : index
    %142 = vector.load %arg6[%c1_60, %c0_61, %c0_62] : memref<4x20x20xf32, #tpu.memory_space<vmem>>, vector<1x16x20xf32>
    %143 = vector.shape_cast %142 : vector<1x16x20xf32> to vector<16x20xf32>
    %144 = vector.broadcast %141 : f32 to vector<16x20xf32>
    %145 = arith.mulf %144, %143 : vector<16x20xf32>
    %146 = arith.addf %140, %145 : vector<16x20xf32>
    %c6_63 = arith.constant 6 : index
    %147 = memref.load %arg2[%c6_63] : memref<20xf32, #tpu.memory_space<smem>>
    %c1_64 = arith.constant 1 : index
    %c1_65 = arith.constant 1 : index
    %c0_66 = arith.constant 0 : index
    %148 = vector.load %arg6[%c1_64, %c1_65, %c0_66] : memref<4x20x20xf32, #tpu.memory_space<vmem>>, vector<1x16x20xf32>
    %149 = vector.shape_cast %148 : vector<1x16x20xf32> to vector<16x20xf32>
    %150 = vector.broadcast %147 : f32 to vector<16x20xf32>
    %151 = arith.mulf %150, %149 : vector<16x20xf32>
    %152 = arith.addf %146, %151 : vector<16x20xf32>
    %c7_67 = arith.constant 7 : index
    %153 = memref.load %arg2[%c7_67] : memref<20xf32, #tpu.memory_space<smem>>
    %c1_68 = arith.constant 1 : index
    %c2_69 = arith.constant 2 : index
    %c0_70 = arith.constant 0 : index
    %154 = vector.load %arg6[%c1_68, %c2_69, %c0_70] : memref<4x20x20xf32, #tpu.memory_space<vmem>>, vector<1x16x20xf32>
    %155 = vector.shape_cast %154 : vector<1x16x20xf32> to vector<16x20xf32>
    %156 = vector.broadcast %153 : f32 to vector<16x20xf32>
    %157 = arith.mulf %156, %155 : vector<16x20xf32>
    %158 = arith.addf %152, %157 : vector<16x20xf32>
    %c8_71 = arith.constant 8 : index
    %159 = memref.load %arg2[%c8_71] : memref<20xf32, #tpu.memory_space<smem>>
    %c1_72 = arith.constant 1 : index
    %c3_73 = arith.constant 3 : index
    %c0_74 = arith.constant 0 : index
    %160 = vector.load %arg6[%c1_72, %c3_73, %c0_74] : memref<4x20x20xf32, #tpu.memory_space<vmem>>, vector<1x16x20xf32>
    %161 = vector.shape_cast %160 : vector<1x16x20xf32> to vector<16x20xf32>
    %162 = vector.broadcast %159 : f32 to vector<16x20xf32>
    %163 = arith.mulf %162, %161 : vector<16x20xf32>
    %164 = arith.addf %158, %163 : vector<16x20xf32>
    %c9_75 = arith.constant 9 : index
    %165 = memref.load %arg2[%c9_75] : memref<20xf32, #tpu.memory_space<smem>>
    %c1_76 = arith.constant 1 : index
    %c4_77 = arith.constant 4 : index
    %c0_78 = arith.constant 0 : index
    %166 = vector.load %arg6[%c1_76, %c4_77, %c0_78] : memref<4x20x20xf32, #tpu.memory_space<vmem>>, vector<1x16x20xf32>
    %167 = vector.shape_cast %166 : vector<1x16x20xf32> to vector<16x20xf32>
    %168 = vector.broadcast %165 : f32 to vector<16x20xf32>
    %169 = arith.mulf %168, %167 : vector<16x20xf32>
    %170 = arith.addf %164, %169 : vector<16x20xf32>
    %c0_79 = arith.constant 0 : index
    %c1_80 = arith.constant 1 : index
    %c0_81 = arith.constant 0 : index
    %c0_82 = arith.constant 0 : index
    %171 = vector.load %arg4[%c0_79, %c1_80, %c0_81, %c0_82] : memref<1x4x16x20xf32, #tpu.memory_space<vmem>>, vector<1x1x16x20xf32>
    %172 = vector.shape_cast %171 : vector<1x1x16x20xf32> to vector<16x20xf32>
    %173 = vector.shape_cast %170 : vector<16x20xf32> to vector<1x1x16x20xf32>
    tpu.vector_store %arg4[%c0_79, %c1_80, %c0_81, %c0_82], %173 {strides = array<i32>} : memref<1x4x16x20xf32, #tpu.memory_space<vmem>>, vector<1x1x16x20xf32>,
    %cst_83 = arith.constant 0.000000e+00 : f32
    %174 = vector.broadcast %cst_83 : f32 to vector<16x20xf32>
    %c10_84 = arith.constant 10 : index
    %175 = memref.load %arg2[%c10_84] : memref<20xf32, #tpu.memory_space<smem>>
    %c2_85 = arith.constant 2 : index
    %c0_86 = arith.constant 0 : index
    %c0_87 = arith.constant 0 : index
    %176 = vector.load %arg6[%c2_85, %c0_86, %c0_87] : memref<4x20x20xf32, #tpu.memory_space<vmem>>, vector<1x16x20xf32>
    %177 = vector.shape_cast %176 : vector<1x16x20xf32> to vector<16x20xf32>
    %178 = vector.broadcast %175 : f32 to vector<16x20xf32>
    %179 = arith.mulf %178, %177 : vector<16x20xf32>
    %180 = arith.addf %174, %179 : vector<16x20xf32>
    %c11_88 = arith.constant 11 : index
    %181 = memref.load %arg2[%c11_88] : memref<20xf32, #tpu.memory_space<smem>>
    %c2_89 = arith.constant 2 : index
    %c1_90 = arith.constant 1 : index
    %c0_91 = arith.constant 0 : index
    %182 = vector.load %arg6[%c2_89, %c1_90, %c0_91] : memref<4x20x20xf32, #tpu.memory_space<vmem>>, vector<1x16x20xf32>
    %183 = vector.shape_cast %182 : vector<1x16x20xf32> to vector<16x20xf32>
    %184 = vector.broadcast %181 : f32 to vector<16x20xf32>
    %185 = arith.mulf %184, %183 : vector<16x20xf32>
    %186 = arith.addf %180, %185 : vector<16x20xf32>
    %c12_92 = arith.constant 12 : index
    %187 = memref.load %arg2[%c12_92] : memref<20xf32, #tpu.memory_space<smem>>
    %c2_93 = arith.constant 2 : index
    %c2_94 = arith.constant 2 : index
    %c0_95 = arith.constant 0 : index
    %188 = vector.load %arg6[%c2_93, %c2_94, %c0_95] : memref<4x20x20xf32, #tpu.memory_space<vmem>>, vector<1x16x20xf32>
    %189 = vector.shape_cast %188 : vector<1x16x20xf32> to vector<16x20xf32>
    %190 = vector.broadcast %187 : f32 to vector<16x20xf32>
    %191 = arith.mulf %190, %189 : vector<16x20xf32>
    %192 = arith.addf %186, %191 : vector<16x20xf32>
    %c13_96 = arith.constant 13 : index
    %193 = memref.load %arg2[%c13_96] : memref<20xf32, #tpu.memory_space<smem>>
    %c2_97 = arith.constant 2 : index
    %c3_98 = arith.constant 3 : index
    %c0_99 = arith.constant 0 : index
    %194 = vector.load %arg6[%c2_97, %c3_98, %c0_99] : memref<4x20x20xf32, #tpu.memory_space<vmem>>, vector<1x16x20xf32>
    %195 = vector.shape_cast %194 : vector<1x16x20xf32> to vector<16x20xf32>
    %196 = vector.broadcast %193 : f32 to vector<16x20xf32>
    %197 = arith.mulf %196, %195 : vector<16x20xf32>
    %198 = arith.addf %192, %197 : vector<16x20xf32>
    %c14_100 = arith.constant 14 : index
    %199 = memref.load %arg2[%c14_100] : memref<20xf32, #tpu.memory_space<smem>>
    %c2_101 = arith.constant 2 : index
    %c4_102 = arith.constant 4 : index
    %c0_103 = arith.constant 0 : index
    %200 = vector.load %arg6[%c2_101, %c4_102, %c0_103] : memref<4x20x20xf32, #tpu.memory_space<vmem>>, vector<1x16x20xf32>
    %201 = vector.shape_cast %200 : vector<1x16x20xf32> to vector<16x20xf32>
    %202 = vector.broadcast %199 : f32 to vector<16x20xf32>
    %203 = arith.mulf %202, %201 : vector<16x20xf32>
    %204 = arith.addf %198, %203 : vector<16x20xf32>
    %c0_104 = arith.constant 0 : index
    %c2_105 = arith.constant 2 : index
    %c0_106 = arith.constant 0 : index
    %c0_107 = arith.constant 0 : index
    %205 = vector.load %arg4[%c0_104, %c2_105, %c0_106, %c0_107] : memref<1x4x16x20xf32, #tpu.memory_space<vmem>>, vector<1x1x16x20xf32>
    %206 = vector.shape_cast %205 : vector<1x1x16x20xf32> to vector<16x20xf32>
    %207 = vector.shape_cast %204 : vector<16x20xf32> to vector<1x1x16x20xf32>
    tpu.vector_store %arg4[%c0_104, %c2_105, %c0_106, %c0_107], %207 {strides = array<i32>} : memref<1x4x16x20xf32, #tpu.memory_space<vmem>>, vector<1x1x16x20xf32>,
    %cst_108 = arith.constant 0.000000e+00 : f32
    %208 = vector.broadcast %cst_108 : f32 to vector<16x20xf32>
    %c15_109 = arith.constant 15 : index
    %209 = memref.load %arg2[%c15_109] : memref<20xf32, #tpu.memory_space<smem>>
    %c3_110 = arith.constant 3 : index
    %c0_111 = arith.constant 0 : index
    %c0_112 = arith.constant 0 : index
    %210 = vector.load %arg6[%c3_110, %c0_111, %c0_112] : memref<4x20x20xf32, #tpu.memory_space<vmem>>, vector<1x16x20xf32>
    %211 = vector.shape_cast %210 : vector<1x16x20xf32> to vector<16x20xf32>
    %212 = vector.broadcast %209 : f32 to vector<16x20xf32>
    %213 = arith.mulf %212, %211 : vector<16x20xf32>
    %214 = arith.addf %208, %213 : vector<16x20xf32>
    %c16_113 = arith.constant 16 : index
    %215 = memref.load %arg2[%c16_113] : memref<20xf32, #tpu.memory_space<smem>>
    %c3_114 = arith.constant 3 : index
    %c1_115 = arith.constant 1 : index
    %c0_116 = arith.constant 0 : index
    %216 = vector.load %arg6[%c3_114, %c1_115, %c0_116] : memref<4x20x20xf32, #tpu.memory_space<vmem>>, vector<1x16x20xf32>
    %217 = vector.shape_cast %216 : vector<1x16x20xf32> to vector<16x20xf32>
    %218 = vector.broadcast %215 : f32 to vector<16x20xf32>
    %219 = arith.mulf %218, %217 : vector<16x20xf32>
    %220 = arith.addf %214, %219 : vector<16x20xf32>
    %c17_117 = arith.constant 17 : index
    %221 = memref.load %arg2[%c17_117] : memref<20xf32, #tpu.memory_space<smem>>
    %c3_118 = arith.constant 3 : index
    %c2_119 = arith.constant 2 : index
    %c0_120 = arith.constant 0 : index
    %222 = vector.load %arg6[%c3_118, %c2_119, %c0_120] : memref<4x20x20xf32, #tpu.memory_space<vmem>>, vector<1x16x20xf32>
    %223 = vector.shape_cast %222 : vector<1x16x20xf32> to vector<16x20xf32>
    %224 = vector.broadcast %221 : f32 to vector<16x20xf32>
    %225 = arith.mulf %224, %223 : vector<16x20xf32>
    %226 = arith.addf %220, %225 : vector<16x20xf32>
    %c18_121 = arith.constant 18 : index
    %227 = memref.load %arg2[%c18_121] : memref<20xf32, #tpu.memory_space<smem>>
    %c3_122 = arith.constant 3 : index
    %c3_123 = arith.constant 3 : index
    %c0_124 = arith.constant 0 : index
    %228 = vector.load %arg6[%c3_122, %c3_123, %c0_124] : memref<4x20x20xf32, #tpu.memory_space<vmem>>, vector<1x16x20xf32>
    %229 = vector.shape_cast %228 : vector<1x16x20xf32> to vector<16x20xf32>
    %230 = vector.broadcast %227 : f32 to vector<16x20xf32>
    %231 = arith.mulf %230, %229 : vector<16x20xf32>
    %232 = arith.addf %226, %231 : vector<16x20xf32>
    %c19_125 = arith.constant 19 : index
    %233 = memref.load %arg2[%c19_125] : memref<20xf32, #tpu.memory_space<smem>>
    %c3_126 = arith.constant 3 : index
    %c4_127 = arith.constant 4 : index
    %c0_128 = arith.constant 0 : index
    %234 = vector.load %arg6[%c3_126, %c4_127, %c0_128] : memref<4x20x20xf32, #tpu.memory_space<vmem>>, vector<1x16x20xf32>
    %235 = vector.shape_cast %234 : vector<1x16x20xf32> to vector<16x20xf32>
    %236 = vector.broadcast %233 : f32 to vector<16x20xf32>
    %237 = arith.mulf %236, %235 : vector<16x20xf32>
    %238 = arith.addf %232, %237 : vector<16x20xf32>
    %c0_129 = arith.constant 0 : index
    %c3_130 = arith.constant 3 : index
    %c0_131 = arith.constant 0 : index
    %c0_132 = arith.constant 0 : index
    %239 = vector.load %arg4[%c0_129, %c3_130, %c0_131, %c0_132] : memref<1x4x16x20xf32, #tpu.memory_space<vmem>>, vector<1x1x16x20xf32>
    %240 = vector.shape_cast %239 : vector<1x1x16x20xf32> to vector<16x20xf32>
    %241 = vector.shape_cast %238 : vector<16x20xf32> to vector<1x1x16x20xf32>
    tpu.vector_store %arg4[%c0_129, %c3_130, %c0_131, %c0_132], %241 {strides = array<i32>} : memref<1x4x16x20xf32, #tpu.memory_space<vmem>>, vector<1x1x16x20xf32>,
    return
  }
  func.func @transform_0(%arg0: i32) -> (i32, i32, i32) {
    %c0_i32 = arith.constant 0 : i32
    %c0_i32_0 = arith.constant 0 : i32
    %c0_i32_1 = arith.constant 0 : i32
    return %arg0, %c0_i32, %c0_i32_0 : i32, i32, i32
  }
  func.func @transform_1(%arg0: i32) -> i32 {
    %c0_i32 = arith.constant 0 : i32
    %c0_i32_0 = arith.constant 0 : i32
    return %c0_i32 : i32
  }
  func.func @transform_2(%arg0: i32) -> i32 {
    %c0_i32 = arith.constant 0 : i32
    %c0_i32_0 = arith.constant 0 : i32
    return %c0_i32 : i32
  }
  func.func @transform_3(%arg0: i32) -> (i32, i32, i32, i32) {
    %c0_i32 = arith.constant 0 : i32
    %c0_i32_0 = arith.constant 0 : i32
    %c0_i32_1 = arith.constant 0 : i32
    %c0_i32_2 = arith.constant 0 : i32
    return %arg0, %c0_i32, %c0_i32_0, %c0_i32_1 : i32, i32, i32, i32
  }
}

</mosaic_0001>

<bundles_post_ra>
// kernel: gaussnet_layer_2d.1
= control target key start
LH: loop header
LB: loop body
LE: loop exit
PB: predicated region body
PF: predicated region fallthrough
CT: control target
= control target key end

     0   :  { %8 = vsyncpa [#allocation5], 0  ;;  %s1337_s0 = inlined_call_operand.vmem [shape: f32[2,16,16], index: 0, kind: input, shape index: {}]   ;;  %s1338_s1 = inlined_call_operand.vmem [shape: f32[20], index: 1, kind: input, shape index: {}]   ;;  %s1339_s2 = inlined_call_operand.vmem [shape: f32[20], index: 2, kind: input, shape index: {}]   ;;  %s1340_s3 = inlined_call_operand.vmem [shape: f32[2,4,16,20], index: 3, kind: output, shape index: {}]  }
   0x1   :  { %9 = vsyncpa [#allocation7], 0  ;;  %s1006_s12 = smov 0  }
   0x2 LB: > { %s1012_s13 = sadd.s32 4294967295, %s976_s12   ;;  %p838_p0 = scmp.ge.s32.totalorder %s976_s12, 1  ;;  %s976_s12 = sphi %s1006_s12, %s15_s12  }
   0x3   : > { %p114_p1 = scmp.lt.s32.totalorder %s976_s12, 3  ;;  %s127_s16 = sshll.u32 %s1338_s1, 4  ;;  %s128_s16 = int_to_ptr.vmem [resolvable:$true] %s127_s16 }
   0x4   : > { %p1341_p3 = scmp.eq.s32.totalorder %s1012_s13, 0  ;;  %s138_s20 = sshll.u32 %s1339_s2, 4  ;;  %s139_s20 = int_to_ptr.vmem [resolvable:$true] %s138_s20 }
   0x5   : > { %p1019_p2 = pnand %p838_p0, %p114_p1  ;;  %s932_s22 = scalar_lea.vmem %s128_s16, 16 }
   0x6   : > { %p933_p6 = scmp.ne.s32.totalorder %s128_s16, %s932_s22  ;;  %p940_p10 = scmp.lt.s32.totalorder %s128_s16, %s128_s16 }
   0x7   : > { %s1343_s17 = scalar_select %p1019_p2, 1, 0 }
   0x8   : > { %p905_p4 = pneg %p1019_p2  ;;  %p941_p11 = scmp.lt.s32.totalorder %s932_s22, %s932_s22 }
   0xa   : > { %p1031_p5 = pnand %p1341_p3, %p905_p4  ;;  %p942_p12 = por %p941_p11, %p940_p10 }
   0xc   : > { %p934_p7 = pneg %p1031_p5 }
   0xe   : > { %p935_p8 = pnand %p934_p7, %p933_p6 }
  0x10   : > { %p936_p9 = pneg %p935_p8 }
  0x12   : > { %p943_p13 = pnand %p942_p12, %p936_p9 }
  0x14   : > { %946 = shalt.err (!%p943_p13)
}
  0x15   : > { %s978_s23 = smov [#allocation4]   ;;  %s947_s24 = scalar_lea.vmem %s139_s20, 16 }
  0x16   : > { %908 = dma.vmem_to_smem (!%p1031_p5), %s128_s16, 16, %s978_s23, [#allocation5]  }
  0x17   : > { %p948_p0 = scmp.ne.s32.totalorder %s139_s20, %s947_s24  ;;  %p955_p3 = scmp.lt.s32.totalorder %s139_s20, %s139_s20 }
  0x18   : > { %p956_p2 = scmp.lt.s32.totalorder %s947_s24, %s947_s24 }
  0x19   : > { %p950_p1 = pnand %p948_p0, %p934_p7 }
  0x1a   : > { %p957_p6 = por %p956_p2, %p955_p3 }
  0x1b   : > { %p951_p4 = pneg %p950_p1 }
  0x1d   : > { %p958_p8 = pnand %p957_p6, %p951_p4 }
  0x1f   : > { %961 = shalt.err (!%p958_p8)
}
  0x20   : > { %s979_s25 = smov [#allocation6]   ;;  %p1345_p9 = scmp.ne.s32.totalorder %s1343_s17, 0 }
  0x21   : > { %911 = dma.vmem_to_smem (!%p1031_p5), %s139_s20, 16, %s979_s25, [#allocation7]  }
  0x22   : > { %159 = sbr.rel (%p1345_p9) target bundleno = 410 (0x19a), region = 32  ;;  %p1346_p10 = scmp.eq.s32.totalorder (!%p1345_p9), %s1012_s13, 0 }
  0x27   : > { %967 = dma.done.wait (%p1346_p10), [#allocation5], 16   ;;  %p1347_p11 = pmov %p1346_p10 }
  0x28   : > { %p1348_p7 = pmov %p1346_p10 }
  0x29   : > { %969 = vsyncadd (%p1347_p11), [#allocation5], 4294967280 }
  0x2a   : > { %971 = dma.done.wait (%p1348_p7), [#allocation7], 16   ;;  %p1349_p2 = pmov %p1348_p7 }
  0x2c   : > { %973 = vsyncadd (%p1349_p2), [#allocation7], 4294967280 }
  0x2d   : > { %169 = sfence }
  0x2e   : > { %p188_p3 = scmp.lt.s32.totalorder %s1012_s13, 1  ;;  %vm198_vm0 = vcmask 195584   ;;  %vm201_vm1 = vcmask 191488   ;;  %v980_v0 = vmov 0.0   ;;  %s981_s30 = smov 2   ;;  %vm213_vm2 = vcmask 146448  }
  0x2f   : > { %199 = vst.msk [vmem:[#allocation2] sm:$0xff] %vm198_vm0, %v980_v0  ;;  %200 = vst.msk [vmem:[#allocation2 + $0x8] sm:$0xff] %vm198_vm0, %v980_v0  ;;  %s852_s4 = sld [smem:[#allocation6 + $0x1]]  ;;  %s982_s7 = smov 127   ;;  %vm571_vm3 = vcmask 162816   ;;  %vm574_vm4 = vcmask 158720  }
  0x30   : > { %202 = vst.msk [vmem:[#allocation2 + $0x10] sm:$0xf] %vm201_vm1, %v980_v0  ;;  %s1351_s13 = smov (!%p188_p3, %s1012_s13), 1  ;;  %s853_s5 = sld [smem:[#allocation6 + $0x6]] }
  0x31   : > { %s895_s26 = sshll.u32 %s1351_s13, 4  ;;  %s854_s6 = sld [smem:[#allocation6 + $0xb]] }
  0x32   : > { %s192_s29 = scalar_lea.vmem %s1337_s0, %s895_s26  ;;  %s855_s8 = sld [smem:[#allocation6 + $0x10]] }
  0x33   : > { %v203_v1 = vld [vmem:[%s192_s29] sm:$0xff]  ;;  %v204_v2 = vld [vmem:[%s192_s29 + $0x8] sm:$0xff]  ;;  %s856_s9 = sld [smem:[#allocation6 + $0x2]]  ;;  %s983_s14 = smov 126  }
  0x34   : > { %207 = vrot.lane.b32.xlu0 %v203_v1, %s981_s30  ;;  %s857_s10 = sld [smem:[#allocation6 + $0x7]]  ;;  %s984_s19 = smov 125  }
  0x35   : > { %v252_v5 = vstv %s852_s4  ;;  %s858_s11 = sld [smem:[#allocation6 + $0xc]]  ;;  %s985_s24 = smov 124  }
  0x36   : > { %v272_v12 = vstv %s853_s5  ;;  %s859_s15 = sld [smem:[#allocation6 + $0x11]] }
  0x37   : > { %v292_v15 = vstv %s854_s6  ;;  %s860_s16 = sld [smem:[#allocation6 + $0x3]] }
  0x38   : > { %209 = vrot.lane.b32.xlu0 %v204_v2, %s981_s30  ;;  %v312_v20 = vstv %s855_s8  ;;  %s861_s17 = sld [smem:[#allocation6 + $0x8]] }
  0x39   : > { %v332_v23 = vstv %s856_s9  ;;  %s862_s18 = sld [smem:[#allocation6 + $0xd]] }
  0x3a   : > { %v352_v28 = vstv %s857_s10  ;;  %s863_s20 = sld [smem:[#allocation6 + $0x12]] }
  0x3b   : > { %v372_v31 = vstv %s858_s11  ;;  %s864_s21 = sld [smem:[#allocation6 + $0x4]] }
  0x3c   : > { %v392_v36 = vstv %s859_s15  ;;  %s865_s22 = sld [smem:[#allocation6 + $0x9]] }
  0x3d   : > { %v412_v39 = vstv %s860_s16  ;;  %s866_s23 = sld [smem:[#allocation6 + $0xe]] }
  0x3e   : > { %v432_v44 = vstv %s861_s17  ;;  %s867_s25 = sld [smem:[#allocation6 + $0x13]] }
  0x3f   : > { %v452_v47 = vstv %s862_s18  ;;  %s219_s26 = sld [smem:[#allocation6]] }
  0x40   : > { %v472_v52 = vstv %s863_s20  ;;  %s849_s27 = sld [smem:[#allocation6 + $0x5]] }
  0x41   : > { %v492_v55 = vstv %s864_s21  ;;  %s850_s28 = sld [smem:[#allocation6 + $0xa]] }
  0x42   : > { %v512_v60 = vstv %s865_s22  ;;  %s851_s29 = sld [smem:[#allocation6 + $0xf]] }
  0x43   : > { %v532_v63 = vstv %s866_s23  ;;  %s1201_s30 = sld [smem:[#allocation4]] }
  0x44   : > { %s1203_s4 = sld [smem:[#allocation4 + $0x1]] }
  0x45   : > { %s1207_s5 = sld [smem:[#allocation4 + $0x2]] }
  0x46   : > { %s1211_s6 = sld [smem:[#allocation4 + $0x3]] }
  0x47   : > { %s1216_s8 = sld [smem:[#allocation4 + $0x5]] }
  0x48   : > { %s1218_s9 = sld [smem:[#allocation4 + $0x6]] }
  0x49   : > { %s1222_s10 = sld [smem:[#allocation4 + $0x7]] }
  0x4a   : > { %s1224_s11 = sld [smem:[#allocation4 + $0x8]] }
  0x4b   : > { %s1249_s15 = sld [smem:[#allocation4 + $0xa]] }
  0x4c   : > { %s1258_s16 = sld [smem:[#allocation4 + $0xb]] }
  0x4d   : > { %s1260_s17 = sld [smem:[#allocation4 + $0xc]] }
  0x4e   : > { %s1263_s18 = sld [smem:[#allocation4 + $0xd]] }
  0x4f   : > { %s1268_s20 = sld [smem:[#allocation4 + $0xf]] }
  0x50   : > { %s1278_s21 = sld [smem:[#allocation4 + $0x10]] }
  0xa6   : > { %v208_v3 = vpop.permute.xlu0 %207 }
  0xa7   : > { %214 = vst.msk [vmem:[#allocation2 + $0x2] sm:$0xff] %vm213_vm2, %v208_v3 }
  0xaa   : > { %v210_v4 = vpop.permute.xlu0 %209 }
  0xab   : > { %215 = vst.msk [vmem:[#allocation2 + $0xa] sm:$0xff] %vm213_vm2, %v210_v4  ;;  %v552_v4 = vstv %s867_s25  ;;  %s1294_s25 = sld [smem:[#allocation4 + $0x11]] }
  0xae   : > { %v1059_v6 = vld [vmem:[#allocation2] sm:$0xff] }
  0xaf   : > { %v253_v7 = vmul.f32 %v252_v5, %v1059_v6  ;;  %v273_v14 = vmul.f32 %v272_v12, %v1059_v6  ;;  %v293_v16 = vmul.f32 %v292_v15, %v1059_v6  ;;  %v313_v22 = vmul.f32 %v312_v20, %v1059_v6 }
  0xb0   : > { %v333_v24 = vmul.f32 %v332_v23, %v1059_v6  ;;  %v353_v30 = vmul.f32 %v352_v28, %v1059_v6  ;;  %v373_v32 = vmul.f32 %v372_v31, %v1059_v6  ;;  %v393_v38 = vmul.f32 %v392_v36, %v1059_v6 }
  0xb1   : > { %259 = vrot.lane.b32.xlu1 %v253_v7, %s982_s7  ;;  %v413_v40 = vmul.f32 %v412_v39, %v1059_v6  ;;  %v433_v46 = vmul.f32 %v432_v44, %v1059_v6  ;;  %v453_v48 = vmul.f32 %v452_v47, %v1059_v6  ;;  %v473_v54 = vmul.f32 %v472_v52, %v1059_v6 }
  0xb2   : > { %v1063_v8 = vld [vmem:[#allocation2 + $0x8] sm:$0xff]  ;;  %v1065_v9 = vld [vmem:[#allocation2 + $0x10] sm:$0xf]  ;;  %v493_v56 = vmul.f32 %v492_v55, %v1059_v6  ;;  %v513_v62 = vmul.f32 %v512_v60, %v1059_v6  ;;  %v533_v0 = vmul.f32 %v532_v63, %v1059_v6  ;;  %v553_v7 = vmul.f32 %v552_v4, %v1059_v6 }
  0xb3   : > { %v255_v10 = vmul.f32 %v252_v5, %v1065_v9  ;;  %v254_v11 = vmul.f32 %v252_v5, %v1063_v8  ;;  %v274_v13 = vmul.f32 %v272_v12, %v1063_v8  ;;  %v275_v17 = vmul.f32 %v272_v12, %v1065_v9 }
  0xb4   : > { %v295_v18 = vmul.f32 %v292_v15, %v1065_v9  ;;  %v294_v19 = vmul.f32 %v292_v15, %v1063_v8  ;;  %v314_v21 = vmul.f32 %v312_v20, %v1063_v8  ;;  %v315_v25 = vmul.f32 %v312_v20, %v1065_v9 }
  0xb5   : > { %263 = vrot.lane.b32.xlu0 %v255_v10, %s982_s7  ;;  %261 = vrot.lane.b32.xlu1 %v254_v11, %s982_s7  ;;  %v335_v26 = vmul.f32 %v332_v23, %v1065_v9  ;;  %v334_v27 = vmul.f32 %v332_v23, %v1063_v8  ;;  %v354_v29 = vmul.f32 %v352_v28, %v1063_v8  ;;  %v220_v11 = vstv %s219_s26  ;;  %s1307_s26 = sld [smem:[#allocation4 + $0x12]] }
  0xb6   : > { %v355_v33 = vmul.f32 %v352_v28, %v1065_v9  ;;  %v375_v34 = vmul.f32 %v372_v31, %v1065_v9  ;;  %v374_v35 = vmul.f32 %v372_v31, %v1063_v8  ;;  %v394_v37 = vmul.f32 %v392_v36, %v1063_v8 }
  0xb7   : > { %v395_v41 = vmul.f32 %v392_v36, %v1065_v9  ;;  %v415_v42 = vmul.f32 %v412_v39, %v1065_v9  ;;  %v414_v43 = vmul.f32 %v412_v39, %v1063_v8  ;;  %v434_v45 = vmul.f32 %v432_v44, %v1063_v8 }
  0xb8   : > { %v435_v49 = vmul.f32 %v432_v44, %v1065_v9  ;;  %v455_v50 = vmul.f32 %v452_v47, %v1065_v9  ;;  %v454_v51 = vmul.f32 %v452_v47, %v1063_v8  ;;  %v474_v53 = vmul.f32 %v472_v52, %v1063_v8 }
  0xb9   : > { %281 = vrot.lane.b32.xlu0 %v274_v13, %s982_s7  ;;  %279 = vrot.lane.b32.xlu1 %v273_v14, %s982_s7  ;;  %v475_v57 = vmul.f32 %v472_v52, %v1065_v9  ;;  %v495_v58 = vmul.f32 %v492_v55, %v1065_v9  ;;  %v494_v59 = vmul.f32 %v492_v55, %v1063_v8  ;;  %v244_v39 = vstv %s851_s29 }
  0xba   : > { %v514_v61 = vmul.f32 %v512_v60, %v1063_v8  ;;  %v515_v1 = vmul.f32 %v512_v60, %v1065_v9  ;;  %v535_v2 = vmul.f32 %v532_v63, %v1065_v9  ;;  %v534_v3 = vmul.f32 %v532_v63, %v1063_v8 }
  0xbb   : > { %v554_v5 = vmul.f32 %v552_v4, %v1063_v8  ;;  %v555_v10 = vmul.f32 %v552_v4, %v1065_v9  ;;  %v221_v12 = vmul.f32 %v220_v11, %v1059_v6  ;;  %v223_v15 = vmul.f32 %v220_v11, %v1065_v9 }
  0xbd   : > { %299 = vrot.lane.b32.xlu0 %v293_v16, %s982_s7  ;;  %283 = vrot.lane.b32.xlu1 %v275_v17, %s982_s7  ;;  %v222_v16 = vmul.f32 %v220_v11, %v1063_v8 }
  0xc1   : > { %303 = vrot.lane.b32.xlu0 %v295_v18, %s982_s7  ;;  %301 = vrot.lane.b32.xlu1 %v294_v19, %s982_s7  ;;  %v228_v19 = vstv %s849_s27  ;;  %s1314_s27 = sld [smem:[#allocation4 + $0x13]] }
  0xc2   : > { %v229_v23 = vmul.f32 %v228_v19, %v1059_v6 }
  0xc5   : > { %321 = vrot.lane.b32.xlu0 %v314_v21, %s982_s7  ;;  %319 = vrot.lane.b32.xlu1 %v313_v22, %s982_s7  ;;  %v230_v22 = vmul.f32 %v228_v19, %v1063_v8 }
  0xc9   : > { %339 = vrot.lane.b32.xlu0 %v333_v24, %s983_s14  ;;  %323 = vrot.lane.b32.xlu1 %v315_v25, %s982_s7  ;;  %s1213_s7 = sld [smem:[#allocation4 + $0x4]] }
  0xcd   : > { %343 = vrot.lane.b32.xlu0 %v335_v26, %s983_s14  ;;  %341 = vrot.lane.b32.xlu1 %v334_v27, %s983_s14  ;;  %v236_v26 = vstv %s850_s28 }
  0xce   : > { %v238_v36 = vmul.f32 %v236_v26, %v1063_v8 }
  0xd1   : > { %361 = vrot.lane.b32.xlu0 %v354_v29, %s983_s14  ;;  %359 = vrot.lane.b32.xlu1 %v353_v30, %s983_s14  ;;  %v237_v29 = vmul.f32 %v236_v26, %v1059_v6  ;;  %v231_v30 = vmul.f32 %v228_v19, %v1065_v9 }
  0xd5   : > { %379 = vrot.lane.b32.xlu0 %v373_v32, %s983_s14  ;;  %363 = vrot.lane.b32.xlu1 %v355_v33, %s983_s14 }
  0xd9   : > { %383 = vrot.lane.b32.xlu0 %v375_v34, %s983_s14  ;;  %381 = vrot.lane.b32.xlu1 %v374_v35, %s983_s14  ;;  %v239_v35 = vmul.f32 %v236_v26, %v1065_v9 }
  0xdd   : > { %401 = vrot.lane.b32.xlu0 %v394_v37, %s983_s14  ;;  %399 = vrot.lane.b32.xlu1 %v393_v38, %s983_s14 }
  0xe1   : > { %419 = vrot.lane.b32.xlu0 %v413_v40, %s984_s19  ;;  %403 = vrot.lane.b32.xlu1 %v395_v41, %s983_s14  ;;  %s1247_s14 = sld [smem:[#allocation4 + $0x9]] }
  0xe5   : > { %423 = vrot.lane.b32.xlu0 %v415_v42, %s984_s19  ;;  %421 = vrot.lane.b32.xlu1 %v414_v43, %s984_s19  ;;  %v246_v42 = vmul.f32 %v244_v39, %v1063_v8  ;;  %v245_v43 = vmul.f32 %v244_v39, %v1059_v6 }
  0xe9   : > { %441 = vrot.lane.b32.xlu0 %v434_v45, %s984_s19  ;;  %439 = vrot.lane.b32.xlu1 %v433_v46, %s984_s19 }
  0xed   : > { %459 = vrot.lane.b32.xlu0 %v453_v48, %s984_s19  ;;  %443 = vrot.lane.b32.xlu1 %v435_v49, %s984_s19  ;;  %v247_v48 = vmul.f32 %v244_v39, %v1065_v9 }
  0xf1   : > { %463 = vrot.lane.b32.xlu0 %v455_v50, %s984_s19  ;;  %461 = vrot.lane.b32.xlu1 %v454_v51, %s984_s19 }
  0xf5   : > { %481 = vrot.lane.b32.xlu0 %v474_v53, %s984_s19  ;;  %479 = vrot.lane.b32.xlu1 %v473_v54, %s984_s19 }
  0xf9   : > { %499 = vrot.lane.b32.xlu0 %v493_v56, %s985_s24  ;;  %483 = vrot.lane.b32.xlu1 %v475_v57, %s984_s19  ;;  %s896_s19 = sshll.u32 %s1351_s13, 6  ;;  %s1275_s13 = sld [smem:[#allocation4 + $0xe]] }
  0xfd   : > { %503 = vrot.lane.b32.xlu0 %v495_v58, %s985_s24  ;;  %501 = vrot.lane.b32.xlu1 %v494_v59, %s985_s24 }
 0x101   : > { %521 = vrot.lane.b32.xlu0 %v514_v61, %s985_s24  ;;  %519 = vrot.lane.b32.xlu1 %v513_v62, %s985_s24 }
 0x105   : > { %539 = vrot.lane.b32.xlu0 %v533_v0, %s985_s24  ;;  %523 = vrot.lane.b32.xlu1 %v515_v1, %s985_s24 }
 0x109   : > { %543 = vrot.lane.b32.xlu0 %v535_v2, %s985_s24  ;;  %541 = vrot.lane.b32.xlu1 %v534_v3, %s985_s24 }
 0x10d   : > { %561 = vrot.lane.b32.xlu0 %v554_v5, %s985_s24  ;;  %559 = vrot.lane.b32.xlu1 %v553_v7, %s985_s24 }
 0x111   : > { %563 = vrot.lane.b32.xlu1 %v555_v10, %s985_s24  ;;  %s1283_s24 = scalar_lea.vmem %s1340_s3, %s896_s19 }
 0x123   : > { %v260_v13 = vpop.permute.xlu1 %259 }
 0x124   : > { %v268_v14 = vadd.f32 %v260_v13, %v221_v12 }
 0x127   : > { %v264_v17 = vpop.permute.xlu0 %263  ;;  %v262_v18 = vpop.permute.xlu1 %261 }
 0x128   : > { %v1152_v20 = vadd.f32 %v264_v17, %v223_v15  ;;  %v1154_v21 = vadd.f32 %v262_v18, %v222_v16 }
 0x12b   : > { %v282_v24 = vpop.permute.xlu0 %281  ;;  %v280_v25 = vpop.permute.xlu1 %279 }
 0x12c   : > { %v1158_v27 = vadd.f32 %v282_v24, %v230_v22  ;;  %v1160_v28 = vadd.f32 %v280_v25, %v229_v23 }
 0x12f   : > { %v300_v31 = vpop.permute.xlu0 %299  ;;  %v284_v32 = vpop.permute.xlu1 %283 }
 0x130   : > { %v1164_v33 = vadd.f32 %v300_v31, %v237_v29  ;;  %v1166_v34 = vadd.f32 %v284_v32, %v231_v30 }
 0x133   : > { %v304_v37 = vpop.permute.xlu0 %303  ;;  %v302_v38 = vpop.permute.xlu1 %301 }
 0x134   : > { %v1170_v40 = vadd.f32 %v304_v37, %v239_v35  ;;  %v1172_v41 = vadd.f32 %v302_v38, %v238_v36  ;;  %v591_v37 = vstv %s1201_s30  ;;  %v599_v38 = vstv %s1203_s4 }
 0x137   : > { %v322_v44 = vpop.permute.xlu0 %321  ;;  %v320_v45 = vpop.permute.xlu1 %319 }
 0x138   : > { %v1176_v46 = vadd.f32 %v322_v44, %v246_v42  ;;  %v1178_v47 = vadd.f32 %v320_v45, %v245_v43  ;;  %v607_v42 = vstv %s1207_s5  ;;  %v615_v43 = vstv %s1211_s6 }
 0x139   : > { %v623_v44 = vstv %s1213_s7 }
 0x13b   : > { %v340_v49 = vpop.permute.xlu0 %339  ;;  %v324_v50 = vpop.permute.xlu1 %323 }
 0x13c   : > { %v1181_v51 = vadd.f32 %v324_v50, %v247_v48  ;;  %v348_v10 = vadd.f32 %v340_v49, %v268_v14  ;;  %v641_v48 = vstv %s1218_s9  ;;  %v649_v49 = vstv %s1222_s10 }
 0x13f   : > { %v344_v52 = vpop.permute.xlu0 %343  ;;  %v342_v53 = vpop.permute.xlu1 %341 }
 0x140   : > { %v350_v15 = vadd.f32 %v344_v52, %v1152_v20  ;;  %v349_v16 = vadd.f32 %v342_v53, %v1154_v21 }
 0x143   : > { %v362_v54 = vpop.permute.xlu0 %361  ;;  %v360_v55 = vpop.permute.xlu1 %359 }
 0x144   : > { %v369_v20 = vadd.f32 %v362_v54, %v1158_v27  ;;  %v368_v21 = vadd.f32 %v360_v55, %v1160_v28 }
 0x147   : > { %v380_v56 = vpop.permute.xlu0 %379  ;;  %v364_v8 = vpop.permute.xlu1 %363 }
 0x148   : > { %v388_v29 = vadd.f32 %v380_v56, %v1164_v33  ;;  %v370_v30 = vadd.f32 %v364_v8, %v1166_v34  ;;  %v633_v33 = vstv %s1216_s8 }
 0x14b   : > { %v1183_v57 = vpop.permute.xlu0 %383  ;;  %v1185_v6 = vpop.permute.xlu1 %381 }
 0x14c   : > { %v390_v53 = vadd.f32 %v1183_v57, %v1170_v40  ;;  %v389_v54 = vadd.f32 %v1185_v6, %v1172_v41 }
 0x14f   : > { %v1187_v58 = vpop.permute.xlu0 %401  ;;  %v1189_v59 = vpop.permute.xlu1 %399 }
 0x150   : > { %v409_v55 = vadd.f32 %v1187_v58, %v1176_v46  ;;  %v408_v40 = vadd.f32 %v1189_v59, %v1178_v47 }
 0x153   : > { %v420_v60 = vpop.permute.xlu0 %419  ;;  %v1191_v9 = vpop.permute.xlu1 %403 }
 0x154   : > { %v428_v11 = vadd.f32 %v420_v60, %v348_v10 }
 0x157   : > { %v424_v61 = vpop.permute.xlu0 %423  ;;  %v422_v62 = vpop.permute.xlu1 %421 }
 0x158   : > { %v430_v14 = vadd.f32 %v424_v61, %v350_v15  ;;  %v429_v18 = vadd.f32 %v422_v62, %v349_v16  ;;  %v657_v61 = vstv %s1224_s11 }
 0x15b   : > { %v442_v63 = vpop.permute.xlu0 %441  ;;  %v440_v0 = vpop.permute.xlu1 %439 }
 0x15c   : > { %v449_v25 = vadd.f32 %v442_v63, %v369_v20  ;;  %v448_v26 = vadd.f32 %v440_v0, %v368_v21 }
 0x15f   : > { %v460_v1 = vpop.permute.xlu0 %459  ;;  %v444_v2 = vpop.permute.xlu1 %443 }
 0x160   : > { %v468_v35 = vadd.f32 %v460_v1, %v388_v29  ;;  %v450_v36 = vadd.f32 %v444_v2, %v370_v30 }
 0x163   : > { %v1193_v3 = vpop.permute.xlu0 %463  ;;  %v1195_v4 = vpop.permute.xlu1 %461 }
 0x164   : > { %v470_v41 = vadd.f32 %v1193_v3, %v390_v53  ;;  %v469_v46 = vadd.f32 %v1195_v4, %v389_v54 }
 0x167   : > { %v1197_v5 = vpop.permute.xlu0 %481  ;;  %v1199_v7 = vpop.permute.xlu1 %479 }
 0x168   : > { %v489_v57 = vadd.f32 %v1197_v5, %v409_v55  ;;  %v488_v47 = vadd.f32 %v1199_v7, %v408_v40  ;;  %v410_v7 = vadd.f32 %v1191_v9, %v1181_v51  ;;  %v676_v55 = vstv %s1249_s15 }
 0x16b   : > { %v500_v12 = vpop.permute.xlu0 %499  ;;  %v1205_v13 = vpop.permute.xlu1 %483 }
 0x16c   : > { %v508_v17 = vadd.f32 %v500_v12, %v428_v11 }
 0x16e   : > { %572 = vst.msk [vmem:[#allocation3] sm:$0xff] %vm571_vm3, %v508_v17 }
 0x16f   : > { %v504_v19 = vpop.permute.xlu0 %503  ;;  %v502_v22 = vpop.permute.xlu1 %501 }
 0x170   : > { %v510_v23 = vadd.f32 %v504_v19, %v430_v14  ;;  %v509_v24 = vadd.f32 %v502_v22, %v429_v18 }
 0x172   : > { %575 = vst.msk [vmem:[#allocation3 + $0x10] sm:$0xf] %vm574_vm4, %v510_v23 }
 0x173   : > { %573 = vst.msk [vmem:[#allocation3 + $0x8] sm:$0xff] %vm571_vm3, %v509_v24  ;;  %v522_v27 = vpop.permute.xlu0 %521  ;;  %v520_v28 = vpop.permute.xlu1 %519 }
 0x174   : > { %v529_v31 = vadd.f32 %v522_v27, %v449_v25  ;;  %v528_v32 = vadd.f32 %v520_v28, %v448_v26 }
 0x175   : > { %v589_v39 = vld [vmem:[#allocation3] sm:$0xff] }
 0x176   : > { %578 = vst.msk [vmem:[#allocation3 + $0x20] sm:$0xff] %vm571_vm3, %v529_v31  ;;  %577 = vst.msk [vmem:[#allocation3 + $0x18] sm:$0xff] %vm571_vm3, %v528_v32  ;;  %v592_v62 = vmul.f32 %v591_v37, %v589_v39 }
 0x177   : > { %v540_v45 = vpop.permute.xlu0 %539  ;;  %v524_v34 = vpop.permute.xlu1 %523 }
 0x178   : > { %v548_v50 = vadd.f32 %v540_v45, %v468_v35  ;;  %v530_v52 = vadd.f32 %v524_v34, %v450_v36 }
 0x17a   : > { %v590_v56 = vld [vmem:[#allocation3 + $0x8] sm:$0xff]  ;;  %581 = vst.msk [vmem:[#allocation3 + $0x30] sm:$0xff] %vm571_vm3, %v548_v50 }
 0x17b   : > { %v597_v8 = vld [vmem:[#allocation3 + $0x1] sm:$0xff]  ;;  %v598_v60 = vld [vmem:[#allocation3 + $0x9] sm:$0xff]  ;;  %v593_v63 = vmul.f32 %v591_v37, %v590_v56  ;;  %579 = vst.msk [vmem:[#allocation3 + $0x28] sm:$0xf] %vm574_vm4, %v530_v52  ;;  %v544_v58 = vpop.permute.xlu0 %543  ;;  %v542_v12 = vpop.permute.xlu1 %541  ;;  %v490_v37 = vadd.f32 %v1205_v13, %v410_v7 }
 0x17c   : > { %v600_v0 = vmul.f32 %v599_v38, %v597_v8  ;;  %v601_v1 = vmul.f32 %v599_v38, %v598_v60  ;;  %v605_v2 = vld [vmem:[#allocation3 + $0x2] sm:$0xff]  ;;  %v606_v10 = vld [vmem:[#allocation3 + $0xa] sm:$0xff]  ;;  %v550_v5 = vadd.f32 %v544_v58, %v470_v41  ;;  %v549_v22 = vadd.f32 %v542_v12, %v469_v46 }
 0x17d   : > { %v613_v11 = vld [vmem:[#allocation3 + $0x3] sm:$0xff]  ;;  %v614_v6 = vld [vmem:[#allocation3 + $0xb] sm:$0xff]  ;;  %v608_v17 = vmul.f32 %v607_v42, %v605_v2  ;;  %v609_v14 = vmul.f32 %v607_v42, %v606_v10  ;;  %v631_v3 = vld [vmem:[#allocation3 + $0x18] sm:$0xff]  ;;  %v665_v38 = vstv %s1247_s14  ;;  %v692_v10 = vstv %s1260_s17 }
 0x17e   : > { %v602_v15 = vadd.f32 %v600_v0, %v592_v62  ;;  %v603_v16 = vadd.f32 %v601_v1, %v593_v63  ;;  %v621_v18 = vld [vmem:[#allocation3 + $0x4] sm:$0xff]  ;;  %v622_v19 = vld [vmem:[#allocation3 + $0xc] sm:$0xff]  ;;  %v616_v59 = vmul.f32 %v615_v43, %v613_v11  ;;  %v639_v4 = vld [vmem:[#allocation3 + $0x19] sm:$0xff]  ;;  %v617_v23 = vmul.f32 %v615_v43, %v614_v6  ;;  %583 = vst.msk [vmem:[#allocation3 + $0x40] sm:$0xf] %vm574_vm4, %v550_v5 }
 0x17f   : > { %v634_v24 = vmul.f32 %v633_v33, %v631_v3  ;;  %v647_v25 = vld [vmem:[#allocation3 + $0x1a] sm:$0xff]  ;;  %v624_v26 = vmul.f32 %v623_v44, %v621_v18  ;;  %v625_v27 = vmul.f32 %v623_v44, %v622_v19  ;;  %v642_v29 = vmul.f32 %v641_v48, %v639_v4  ;;  %582 = vst.msk [vmem:[#allocation3 + $0x38] sm:$0xff] %vm571_vm3, %v549_v22  ;;  %v562_v30 = vpop.permute.xlu0 %561  ;;  %v560_v31 = vpop.permute.xlu1 %559 }
 0x180   : > { %v610_v20 = vadd.f32 %v608_v17, %v602_v15  ;;  %v611_v21 = vadd.f32 %v609_v14, %v603_v16  ;;  %v632_v28 = vld [vmem:[#allocation3 + $0x20] sm:$0xff]  ;;  %v569_v9 = vadd.f32 %v562_v30, %v489_v57  ;;  %v568_v36 = vadd.f32 %v560_v31, %v488_v47 }
 0x181   : > { %v655_v51 = vld [vmem:[#allocation3 + $0x1b] sm:$0xff]  ;;  %v644_v39 = vadd.f32 %v642_v29, %v634_v24  ;;  %v650_v42 = vmul.f32 %v649_v49, %v647_v25  ;;  %v635_v50 = vmul.f32 %v633_v33, %v632_v28  ;;  %v674_v56 = vld [vmem:[#allocation3 + $0x30] sm:$0xff]  ;;  %v684_v62 = vstv %s1258_s16 }
 0x182   : > { %v618_v32 = vadd.f32 %v616_v59, %v610_v20  ;;  %v619_v35 = vadd.f32 %v617_v23, %v611_v21  ;;  %v640_v43 = vld [vmem:[#allocation3 + $0x21] sm:$0xff]  ;;  %586 = vst.msk [vmem:[#allocation3 + $0x50] sm:$0xff] %vm571_vm3, %v569_v9  ;;  %585 = vst.msk [vmem:[#allocation3 + $0x48] sm:$0xff] %vm571_vm3, %v568_v36  ;;  %v658_v54 = vmul.f32 %v657_v61, %v655_v51  ;;  %v700_v11 = vstv %s1263_s18 }
 0x183   : > { %v648_v44 = vld [vmem:[#allocation3 + $0x22] sm:$0xff]  ;;  %v643_v53 = vmul.f32 %v641_v48, %v640_v43  ;;  %v652_v13 = vadd.f32 %v650_v42, %v644_v39  ;;  %v564_v33 = vpop.permute.xlu1 %563  ;;  %v677_v40 = vmul.f32 %v676_v55, %v674_v56  ;;  %v719_v12 = vstv %s1268_s20 }
 0x184   : > { %v626_v45 = vadd.f32 %v624_v26, %v618_v32  ;;  %v627_v34 = vadd.f32 %v625_v27, %v619_v35  ;;  %v663_v52 = vld [vmem:[#allocation3 + $0x1c] sm:$0xff]  ;;  %v651_v60 = vmul.f32 %v649_v49, %v648_v44  ;;  %v570_v63 = vadd.f32 %v564_v33, %v490_v37  ;;  %v664_v2 = vld [vmem:[#allocation3 + $0x24] sm:$0xff] }
 0x185   : > { %v656_v8 = vld [vmem:[#allocation3 + $0x23] sm:$0xff]  ;;  %v645_v48 = vadd.f32 %v643_v53, %v635_v50  ;;  %v660_v0 = vadd.f32 %v658_v54, %v652_v13  ;;  %v666_v1 = vmul.f32 %v665_v38, %v663_v52  ;;  %v708_v59 = vstv %s1275_s13 }
 0x186   : > { %628 = vst.msk [vmem:[%s1283_s24] sm:$0xff] %vm571_vm3, %v626_v45  ;;  %629 = vst.msk [vmem:[%s1283_s24 + $0x8] sm:$0xff] %vm571_vm3, %v627_v34  ;;  %v659_v46 = vmul.f32 %v657_v61, %v656_v8  ;;  %v675_v57 = vld [vmem:[#allocation3 + $0x38] sm:$0xff]  ;;  %v667_v61 = vmul.f32 %v665_v38, %v664_v2  ;;  %v727_v5 = vstv %s1278_s21  ;;  %v735_v28 = vstv %s1294_s25 }
 0x187   : > { %v653_v41 = vadd.f32 %v651_v60, %v645_v48  ;;  %v682_v6 = vld [vmem:[#allocation3 + $0x31] sm:$0xff]  ;;  %v683_v58 = vld [vmem:[#allocation3 + $0x39] sm:$0xff]  ;;  %587 = vst.msk [vmem:[#allocation3 + $0x58] sm:$0xf] %vm574_vm4, %v570_v63  ;;  %v668_v49 = vadd.f32 %v666_v1, %v660_v0  ;;  %v678_v15 = vmul.f32 %v676_v55, %v675_v57  ;;  %v743_v38 = vstv %s1307_s26 }
 0x188   : > { %v685_v16 = vmul.f32 %v684_v62, %v682_v6  ;;  %v686_v17 = vmul.f32 %v684_v62, %v683_v58  ;;  %v690_v14 = vld [vmem:[#allocation3 + $0x32] sm:$0xff]  ;;  %v691_v18 = vld [vmem:[#allocation3 + $0x3a] sm:$0xff]  ;;  %v751_v53 = vstv %s1314_s27 }
 0x189   : > { %v698_v19 = vld [vmem:[#allocation3 + $0x33] sm:$0xff]  ;;  %v661_v47 = vadd.f32 %v659_v46, %v653_v41  ;;  %v699_v3 = vld [vmem:[#allocation3 + $0x3b] sm:$0xff]  ;;  %877 = vst.msk [vmem:[%s1283_s24 + $0x10] sm:$0xff] %vm571_vm3, %v668_v49  ;;  %v693_v21 = vmul.f32 %v692_v10, %v690_v14  ;;  %v694_v23 = vmul.f32 %v692_v10, %v691_v18  ;;  %v717_v25 = vld [vmem:[#allocation3 + $0x48] sm:$0xff] }
 0x18a   : > { %v706_v4 = vld [vmem:[#allocation3 + $0x34] sm:$0xff]  ;;  %v687_v22 = vadd.f32 %v685_v16, %v677_v40  ;;  %v688_v20 = vadd.f32 %v686_v17, %v678_v15  ;;  %v707_v24 = vld [vmem:[#allocation3 + $0x3c] sm:$0xff]  ;;  %v725_v7 = vld [vmem:[#allocation3 + $0x49] sm:$0xff]  ;;  %v701_v27 = vmul.f32 %v700_v11, %v698_v19  ;;  %v720_v29 = vmul.f32 %v719_v12, %v717_v25 }
 0x18b   : > { %v669_v26 = vadd.f32 %v667_v61, %v661_v47  ;;  %v733_v30 = vld [vmem:[#allocation3 + $0x4a] sm:$0xff]  ;;  %v702_v35 = vmul.f32 %v700_v11, %v699_v3  ;;  %v728_v9 = vmul.f32 %v727_v5, %v725_v7  ;;  %v709_v36 = vmul.f32 %v708_v59, %v706_v4 }
 0x18c   : > { %v695_v31 = vadd.f32 %v693_v21, %v687_v22  ;;  %v696_v32 = vadd.f32 %v694_v23, %v688_v20  ;;  %v718_v51 = vld [vmem:[#allocation3 + $0x50] sm:$0xff]  ;;  %v710_v37 = vmul.f32 %v708_v59, %v707_v24  ;;  %v736_v45 = vmul.f32 %v735_v28, %v733_v30 }
 0x18d   : > { %878 = vst.msk [vmem:[%s1283_s24 + $0x18] sm:$0xff] %vm571_vm3, %v669_v26  ;;  %v741_v39 = vld [vmem:[#allocation3 + $0x4b] sm:$0xff]  ;;  %v730_v44 = vadd.f32 %v728_v9, %v720_v29  ;;  %v721_v52 = vmul.f32 %v719_v12, %v718_v51 }
 0x18e   : > { %v703_v42 = vadd.f32 %v701_v27, %v695_v31  ;;  %v704_v43 = vadd.f32 %v702_v35, %v696_v32  ;;  %v726_v34 = vld [vmem:[#allocation3 + $0x51] sm:$0xff]  ;;  %v744_v33 = vmul.f32 %v743_v38, %v741_v39 }
 0x18f   : > { %v734_v50 = vld [vmem:[#allocation3 + $0x52] sm:$0xff]  ;;  %v729_v54 = vmul.f32 %v727_v5, %v726_v34  ;;  %v738_v8 = vadd.f32 %v736_v45, %v730_v44 }
 0x190   : > { %v749_v13 = vld [vmem:[#allocation3 + $0x4c] sm:$0xff]  ;;  %v711_v55 = vadd.f32 %v709_v36, %v703_v42  ;;  %v712_v56 = vadd.f32 %v710_v37, %v704_v43  ;;  %v737_v62 = vmul.f32 %v735_v28, %v734_v50  ;;  %v750_v1 = vld [vmem:[#allocation3 + $0x54] sm:$0xff] }
 0x191   : > { %v742_v48 = vld [vmem:[#allocation3 + $0x53] sm:$0xff]  ;;  %v731_v60 = vadd.f32 %v729_v54, %v721_v52  ;;  %v746_v63 = vadd.f32 %v744_v33, %v738_v8  ;;  %v752_v0 = vmul.f32 %v751_v53, %v749_v13  ;;  %v753_v41 = vmul.f32 %v751_v53, %v750_v1 }
 0x192   : > { %884 = vst.msk [vmem:[%s1283_s24 + $0x20] sm:$0xff] %vm571_vm3, %v711_v55  ;;  %885 = vst.msk [vmem:[%s1283_s24 + $0x28] sm:$0xff] %vm571_vm3, %v712_v56  ;;  %v745_v10 = vmul.f32 %v743_v38, %v742_v48 }
 0x193   : > { %v739_v2 = vadd.f32 %v737_v62, %v731_v60  ;;  %v754_v11 = vadd.f32 %v752_v0, %v746_v63 }
 0x195   : > { %v747_v40 = vadd.f32 %v745_v10, %v739_v2  ;;  %891 = vst.msk [vmem:[%s1283_s24 + $0x30] sm:$0xff] %vm571_vm3, %v754_v11 }
 0x197   : > { %v755_v46 = vadd.f32 %v753_v41, %v747_v40 }
 0x199   : > { %892 = vst.msk [vmem:[%s1283_s24 + $0x38] sm:$0xff] %vm571_vm3, %v755_v46 }
 0x19a PF: > { %s15_s12 = sadd.s32 1, %s976_s12  }
 0x19b   : > { %p12_p5 = scmp.ge.s32.totalorder %s15_s12, 4  }
 0x19d   :  { %14 = sbr.rel (!%p12_p5) target bundleno = 2 (0x2), region = 77 }
 0x1a2   :  { %780 = vsyncpa [#allocation5], 1 }
 0x1a3   :  { %782 = vsyncpa [#allocation5 + $0x1], 1 }
 0x1a4   :  { %783 = vsyncpa [#allocation7], 1 }

</bundles_post_ra>
